<compile_context>
chip_gen: v7x
topology: tpu7x:2x2x1
jax: 0.10.0
libtpu: 0.0.40
codegen_flags: <defaults>
</compile_context>

<pallas_src>
import jax
import jax.numpy as jnp
from jax.experimental import pallas as pl
from jax.experimental.pallas import tpu as pltpu

_EPS = 1e-6  # LayerNorm eps from the PyTorch module


def _round_up(a: int, b: int) -> int:
    return (a + b - 1) // b * b


def _vmem_limit_bytes() -> int:
    """Generation-aware scoped-VMEM limit (~85% of per-core capacity)."""
    try:
        return int(pltpu.get_tpu_info().vmem_capacity_bytes * 0.85)
    except Exception:
        return int(0.85 * (64 << 20))  # conservative fallback (v7x per-core VMEM)


def _pick_tn(H: int) -> int:
    """Column tile for the weight: whole H when small, else a 128-multiple divisor."""
    if H <= 2048:
        return H
    for tn in (2048, 1024, 512, 256, 128):
        if H % tn == 0:
            return tn
    return 128  # unreachable when H % 128 == 0


def _make_kernel(n_col_blocks: int):
    def kernel(x_ref, gamma_ref, beta_ref, w_ref, b_ref, o_ref, xn_ref):
        # x_ref:     (TM, H)  row tile, input dtype
        # gamma/beta:(1, H)   f32
        # w_ref:     (H, TN)  bf16 weight column slice
        # b_ref:     (1, TN)  f32 bias slice
        # o_ref:     (TM, TN) output tile
        # xn_ref:    (TM, H)  bf16 scratch holding LayerNorm(x) for the current row tile
        j = pl.program_id(1)
        tn = o_ref.shape[-1]
        h = x_ref.shape[-1]

        # --- LayerNorm once per row tile (f32), reused for every column block ---
        @pl.when(j == 0)
        def _():
            x = x_ref[...].astype(jnp.float32)
            mean = jnp.mean(x, axis=-1, keepdims=True)
            diff = x - mean
            var_unbiased = jnp.sum(diff * diff, axis=-1, keepdims=True) / (h - 1)
            xn = diff * jax.lax.rsqrt(var_unbiased + _EPS)
            xn = gamma_ref[...] * xn + beta_ref[...]
            xn_ref[...] = xn.astype(jnp.bfloat16)

        # --- sublayer: Linear column slice on the MXU (bf16 operands, f32 acc) ---
        y = jnp.dot(xn_ref[...], w_ref[...], preferred_element_type=jnp.float32)
        y = y + b_ref[...]

        # --- residual add in f32; dropout = identity (eval mode) ---
        if n_col_blocks == 1:
            x_cols = x_ref[...].astype(jnp.float32)
        else:
            col0 = pl.multiple_of(j * tn, 128)
            x_cols = x_ref[:, pl.ds(col0, tn)].astype(jnp.float32)
        o_ref[...] = (x_cols + y).astype(o_ref.dtype)

    return kernel


def sublayer_connection(x, gamma, beta, w, b, *, tm=None, donate_x=False):
    """x: (B, S, H). Returns x + Linear(LayerNorm(x)) (dropout = identity, eval mode).

    `w` should be pre-cast to bfloat16 once at model setup (hoists the cast out of
    the per-call path); any other dtype is cast here as a fallback.
    """
    B, S, H = x.shape
    assert H % 128 == 0 and H >= 128, "H must be a multiple of 128 (lane-dense stores)"
    M = B * S

    if w.dtype != jnp.bfloat16:
        w = w.astype(jnp.bfloat16)  # fallback; prefer pre-casting at setup

    tn = _pick_tn(H)
    n_col = H // tn

    # Row tile: big tiles amortize per-step overhead (bandwidth-bound op); shrink to
    # fit the per-generation VMEM budget, and never over-pad tiny inputs.
    if tm is None:
        tm = 1024 if H <= 2048 else 512
    tm_eff = _round_up(min(tm, _round_up(M, 8)), 8)

    vmem_limit = _vmem_limit_bytes()
    x_bytes = jnp.dtype(x.dtype).itemsize
    w_bufs = 1 if n_col == 1 else 2  # weight single-buffered only when resident/constant

    def _est(t):
        return (2 * t * H * x_bytes        # x row tiles (double-buffered)
                + 2 * t * tn * x_bytes     # output tiles (double-buffered)
                + w_bufs * H * tn * 2      # bf16 weight block(s)
                + t * H * 2                # bf16 LayerNorm scratch
                + 6 * H * 4)               # gamma / beta / bias
    while tm_eff > 8 and _est(tm_eff) > vmem_limit:
        tm_eff = max(8, _round_up(tm_eff // 2, 8))

    n_row = pl.cdiv(M, tm_eff)  # partial last block handled by Pallas (no wrapper pad)

    x2 = x.reshape(M, H)
    gamma2 = gamma.reshape(1, H).astype(jnp.float32)
    beta2 = beta.reshape(1, H).astype(jnp.float32)
    b2 = b.reshape(1, H).astype(jnp.float32)

    def _spec(shape, imap, single_buffer=False):
        if single_buffer:
            return pl.BlockSpec(shape, imap, pipeline_mode=pl.Buffered(1))
        return pl.BlockSpec(shape, imap)

    in_specs = [
        _spec((tm_eff, H), lambda i, j: (i, 0)),                          # x rows
        _spec((1, H), lambda i, j: (0, 0), single_buffer=True),           # gamma
        _spec((1, H), lambda i, j: (0, 0), single_buffer=True),           # beta
        _spec((H, tn), lambda i, j: (0, j), single_buffer=(n_col == 1)),  # weight slice
        _spec((1, tn), lambda i, j: (0, j), single_buffer=(n_col == 1)),  # bias slice
    ]
    out_spec = pl.BlockSpec((tm_eff, tn), lambda i, j: (i, j))

    alias = {0: 0} if donate_x else {}

    out = pl.pallas_call(
        _make_kernel(n_col),
        out_shape=jax.ShapeDtypeStruct((M, H), x.dtype),
        grid_spec=pltpu.PrefetchScalarGridSpec(
            num_scalar_prefetch=0,
            grid=(n_row, n_col),
            in_specs=in_specs,
            out_specs=out_spec,
            scratch_shapes=[pltpu.VMEM((tm_eff, H), jnp.bfloat16)],
        ),
        compiler_params=pltpu.CompilerParams(
            # rows parallel (megacore); column axis must stay "arbitrary" because the
            # LayerNorm scratch is only written at j == 0.
            dimension_semantics=("parallel", "arbitrary"),
            vmem_limit_bytes=vmem_limit,
        ),
        input_output_aliases=alias,
    )(x2, gamma2, beta2, w, b2)

    return out.reshape(B, S, H)


def reference_bf16_matmul(x, gamma, beta, w, b):
    """Mirrors the kernel numerics (f32 LayerNorm, bf16 matmul operands, f32 acc)."""
    H = x.shape[-1]
    mean = jnp.mean(x, axis=-1, keepdims=True)
    diff = x - mean
    var_unb = jnp.sum(diff * diff, axis=-1, keepdims=True) / (H - 1)
    xn = gamma * (diff * jax.lax.rsqrt(var_unb + _EPS)) + beta
    y = jnp.dot(
        xn.reshape(-1, H).astype(jnp.bfloat16),
        w.astype(jnp.bfloat16),
        preferred_element_type=jnp.float32,
    ).reshape(x.shape) + b
    return x + y


def reference_f32(x, gamma, beta, w, b):
    """Full-f32 reference matching the PyTorch module (eval mode)."""
    H = x.shape[-1]
    mean = jnp.mean(x, axis=-1, keepdims=True)
    diff = x - mean
    var_unb = jnp.sum(diff * diff, axis=-1, keepdims=True) / (H - 1)
    xn = gamma * (diff / jnp.sqrt(var_unb + _EPS)) + beta
    return x + (xn @ w + b)


if __name__ == "__main__":
    B, S, H = 2, 8, 128  # batch=2, seq=8, hidden=128 (lane-aligned feature axis)
    key = jax.random.PRNGKey(0)
    kx, kw, kb = jax.random.split(key, 3)

    x = jax.random.normal(kx, (B, S, H), dtype=jnp.float32)

    # LayerNorm params (module __init__: a_2 = ones(size), b_2 = zeros(size))
    gamma = jnp.ones((H,), jnp.float32)
    beta = jnp.zeros((H,), jnp.float32)

    # Deterministic sublayer (Linear) weights; bf16 cast hoisted to setup time.
    w = jax.random.normal(kw, (H, H), dtype=jnp.float32) * 0.02
    b = jax.random.normal(kb, (H,), dtype=jnp.float32) * 0.02
    w_bf16 = w.astype(jnp.bfloat16)

    run = jax.jit(sublayer_connection)
    out = jax.block_until_ready(run(x, gamma, beta, w_bf16, b))

    assert out.shape == (B, S, H)
    ref_bf16 = reference_bf16_matmul(x, gamma, beta, w, b)
    assert jnp.allclose(out, ref_bf16, atol=1e-3, rtol=1e-3), "mismatch vs bf16 reference"
    ref_f32 = reference_f32(x, gamma, beta, w, b)
    assert jnp.allclose(out, ref_f32, atol=5e-2, rtol=5e-2), "mismatch vs f32 reference"

    print("KERNEL_OK")
</pallas_src>

<mosaic_0001>
module attributes {stable_mosaic.version = 11 : i64} {
  func.func @kernel(%arg0: i32, %arg1: i32, %arg2: memref<16x128xf32, #tpu.memory_space<vmem>>, %arg3: memref<1x128xf32, #tpu.memory_space<vmem>>, %arg4: memref<1x128xf32, #tpu.memory_space<vmem>>, %arg5: memref<128x128xbf16, #tpu.memory_space<vmem>>, %arg6: memref<1x128xf32, #tpu.memory_space<vmem>>, %arg7: memref<16x128xf32, #tpu.memory_space<vmem>>, %arg8: memref<16x128xbf16, #tpu.memory_space<vmem>>) attributes {dimension_semantics = [#tpu.dimension_semantics<parallel>, #tpu.dimension_semantics<arbitrary>], iteration_bounds = array<i64: 1, 1>, scalar_prefetch = 0 : i64, scratch_operands = 1 : i64, tpu.core_type = #tpu.core_type<tc>, window_params = [{transform_indices = @transform_0, window_bounds = array<i64: 16, 128>}, {pipeline_mode = #tpu.pipeline_mode<synchronous>, transform_indices = @transform_1, window_bounds = array<i64: 1, 128>}, {pipeline_mode = #tpu.pipeline_mode<synchronous>, transform_indices = @transform_2, window_bounds = array<i64: 1, 128>}, {pipeline_mode = #tpu.pipeline_mode<synchronous>, transform_indices = @transform_3, window_bounds = array<i64: 128, 128>}, {pipeline_mode = #tpu.pipeline_mode<synchronous>, transform_indices = @transform_4, window_bounds = array<i64: 1, 128>}, {transform_indices = @transform_5, window_bounds = array<i64: 16, 128>}]} {
    %c0_i32 = arith.constant 0 : i32
    %0 = arith.cmpi eq, %arg1, %c0_i32 : i32
    %1 = arith.extui %0 : i1 to i32
    %c0_i32_0 = arith.constant 0 : i32
    %2 = arith.cmpi ne, %1, %c0_i32_0 : i32
    scf.if %2 {
      %c0_10 = arith.constant 0 : index
      %c0_11 = arith.constant 0 : index
      %12 = vector.load %arg2[%c0_10, %c0_11] : memref<16x128xf32, #tpu.memory_space<vmem>>, vector<16x128xf32>
      %cst_12 = arith.constant dense<0.000000e+00> : vector<16xf32>
      %13 = vector.multi_reduction <add>, %12, %cst_12 [1] : vector<16x128xf32> to vector<16xf32>
      %14 = vector.shape_cast %13 : vector<16xf32> to vector<16x1xf32>
      %cst_13 = arith.constant 1.280000e+02 : f32
      %15 = vector.broadcast %cst_13 : f32 to vector<16x1xf32>
      %16 = arith.divf %14, %15 : vector<16x1xf32>
      %17 = vector.broadcast %16 : vector<16x1xf32> to vector<16x128xf32>
      %18 = arith.subf %12, %17 : vector<16x128xf32>
      %19 = arith.mulf %18, %18 : vector<16x128xf32>
      %cst_14 = arith.constant dense<0.000000e+00> : vector<16xf32>
      %20 = vector.multi_reduction <add>, %19, %cst_14 [1] : vector<16x128xf32> to vector<16xf32>
      %21 = vector.shape_cast %20 : vector<16xf32> to vector<16x1xf32>
      %cst_15 = arith.constant 1.270000e+02 : f32
      %22 = vector.broadcast %cst_15 : f32 to vector<16x1xf32>
      %23 = arith.divf %21, %22 : vector<16x1xf32>
      %cst_16 = arith.constant 9.99999997E-7 : f32
      %24 = vector.broadcast %cst_16 : f32 to vector<16x1xf32>
      %25 = arith.addf %23, %24 : vector<16x1xf32>
      %26 = math.rsqrt %25 : vector<16x1xf32>
      %27 = vector.broadcast %26 : vector<16x1xf32> to vector<16x128xf32>
      %28 = arith.mulf %18, %27 : vector<16x128xf32>
      %c0_17 = arith.constant 0 : index
      %c0_18 = arith.constant 0 : index
      %29 = vector.load %arg3[%c0_17, %c0_18] : memref<1x128xf32, #tpu.memory_space<vmem>>, vector<1x128xf32>
      %30 = vector.broadcast %29 : vector<1x128xf32> to vector<16x128xf32>
      %31 = arith.mulf %30, %28 : vector<16x128xf32>
      %c0_19 = arith.constant 0 : index
      %c0_20 = arith.constant 0 : index
      %32 = vector.load %arg4[%c0_19, %c0_20] : memref<1x128xf32, #tpu.memory_space<vmem>>, vector<1x128xf32>
      %33 = vector.broadcast %32 : vector<1x128xf32> to vector<16x128xf32>
      %34 = arith.addf %31, %33 : vector<16x128xf32>
      %35 = arith.truncf %34 : vector<16x128xf32> to vector<16x128xbf16>
      %c0_21 = arith.constant 0 : index
      %c0_22 = arith.constant 0 : index
      %36 = vector.load %arg8[%c0_21, %c0_22] : memref<16x128xbf16, #tpu.memory_space<vmem>>, vector<16x128xbf16>
      tpu.vector_store %arg8[%c0_21, %c0_22], %35 {strides = array<i32>} : memref<16x128xbf16, #tpu.memory_space<vmem>>, vector<16x128xbf16>,
    } else {
    }
    %c0 = arith.constant 0 : index
    %c0_1 = arith.constant 0 : index
    %3 = vector.load %arg8[%c0, %c0_1] : memref<16x128xbf16, #tpu.memory_space<vmem>>, vector<16x128xbf16>
    %c0_2 = arith.constant 0 : index
    %c0_3 = arith.constant 0 : index
    %4 = vector.load %arg5[%c0_2, %c0_3] : memref<128x128xbf16, #tpu.memory_space<vmem>>, vector<128x128xbf16>
    %cst = arith.constant dense<0.000000e+00> : vector<16x128xf32>
    %5 = tpu.matmul %3, %4, %cst {dimension_numbers = #tpu.dot_dimension_numbers<[1], [0], [0], [1], [0, 0, 1, 1], [], []>} : vector<16x128xbf16>, vector<128x128xbf16>, vector<16x128xf32> -> vector<16x128xf32>
    %c0_4 = arith.constant 0 : index
    %c0_5 = arith.constant 0 : index
    %6 = vector.load %arg6[%c0_4, %c0_5] : memref<1x128xf32, #tpu.memory_space<vmem>>, vector<1x128xf32>
    %7 = vector.broadcast %6 : vector<1x128xf32> to vector<16x128xf32>
    %8 = arith.addf %5, %7 : vector<16x128xf32>
    %c0_6 = arith.constant 0 : index
    %c0_7 = arith.constant 0 : index
    %9 = vector.load %arg2[%c0_6, %c0_7] : memref<16x128xf32, #tpu.memory_space<vmem>>, vector<16x128xf32>
    %10 = arith.addf %9, %8 : vector<16x128xf32>
    %c0_8 = arith.constant 0 : index
    %c0_9 = arith.constant 0 : index
    %11 = vector.load %arg7[%c0_8, %c0_9] : memref<16x128xf32, #tpu.memory_space<vmem>>, vector<16x128xf32>
    tpu.vector_store %arg7[%c0_8, %c0_9], %10 {strides = array<i32>} : memref<16x128xf32, #tpu.memory_space<vmem>>, vector<16x128xf32>,
    return
  }
  func.func @transform_0(%arg0: i32, %arg1: i32) -> (i32, i32) {
    %c0_i32 = arith.constant 0 : i32
    %c0_i32_0 = arith.constant 0 : i32
    return %arg0, %c0_i32 : i32, i32
  }
  func.func @transform_1(%arg0: i32, %arg1: i32) -> (i32, i32) {
    %c0_i32 = arith.constant 0 : i32
    %c0_i32_0 = arith.constant 0 : i32
    %c0_i32_1 = arith.constant 0 : i32
    return %c0_i32, %c0_i32_0 : i32, i32
  }
  func.func @transform_2(%arg0: i32, %arg1: i32) -> (i32, i32) {
    %c0_i32 = arith.constant 0 : i32
    %c0_i32_0 = arith.constant 0 : i32
    %c0_i32_1 = arith.constant 0 : i32
    return %c0_i32, %c0_i32_0 : i32, i32
  }
  func.func @transform_3(%arg0: i32, %arg1: i32) -> (i32, i32) {
    %c0_i32 = arith.constant 0 : i32
    %c0_i32_0 = arith.constant 0 : i32
    return %c0_i32, %arg1 : i32, i32
  }
  func.func @transform_4(%arg0: i32, %arg1: i32) -> (i32, i32) {
    %c0_i32 = arith.constant 0 : i32
    %c0_i32_0 = arith.constant 0 : i32
    return %c0_i32, %arg1 : i32, i32
  }
  func.func @transform_5(%arg0: i32, %arg1: i32) -> (i32, i32) {
    %c0_i32 = arith.constant 0 : i32
    return %arg0, %arg1 : i32, i32
  }
}

</mosaic_0001>

<bundles_post_ra>
// kernel: sublayer_connection.1
= control target key start
LH: loop header
LB: loop body
LE: loop exit
PB: predicated region body
PF: predicated region fallthrough
CT: control target
= control target key end

     0   :  { %10 = vsyncpa [#allocation4], 0  ;;  %s470_s0 = inlined_call_operand.hbm [shape: f32[16,128], index: 0, kind: input, shape index: {}]   ;;  %s471_s1 = inlined_call_operand.vmem [shape: f32[1,128], index: 1, kind: input, shape index: {}]   ;;  %s472_s2 = inlined_call_operand.vmem [shape: f32[1,128], index: 2, kind: input, shape index: {}]   ;;  %s473_s3 = inlined_call_operand.hbm [shape: bf16[128,128], index: 3, kind: input, shape index: {}]   ;;  %s474_s4 = inlined_call_operand.vmem [shape: f32[1,128], index: 4, kind: input, shape index: {}]   ;;  %s475_s5 = inlined_call_operand.hbm [shape: f32[16,128], index: 5, kind: output, shape index: {}]  }
   0x1   :  { %11 = vsyncpa [#allocation7], 0 }
   0x2   :  { %12 = vsyncpa [#allocation5], 0  ;;  %s370_s18 = smov [#allocation3]   ;;  %s298_s22 = scalar_lea.hbm %s470_s0, 256 }
   0x3   :  { %s18_s19 = sshll.u32 %s370_s18, 4  ;;  %p299_p0 = scmp.ne.s32.totalorder %s470_s0, %s298_s22  ;;  %s19_s19 = int_to_ptr.vmem [resolvable:$true] %s18_s19 }
   0x4   :  { %p302_p1 = scmp.lt.u32.totalorder %s298_s22, %s470_s0 }
   0x6   :  { %p304_p2 = pnand %p302_p1, %p299_p0 }
   0x8   :  { %307 = shalt.err (!%p304_p2)
}
   0x9   :  { %s308_s27 = scalar_lea.vmem %s19_s19, 256  ;;  %p313_p4 = scmp.lt.s32.totalorder %s19_s19, %s19_s19 }
   0xa   :  { %p309_p3 = scmp.ne.s32.totalorder %s19_s19, %s308_s27  ;;  %p314_p5 = scmp.lt.s32.totalorder %s308_s27, %s308_s27 }
   0xc   :  { %p315_p6 = por %p314_p5, %p313_p4 }
   0xe   :  { %p316_p7 = pnand %p315_p6, %p309_p3 }
  0x10   :  { %319 = shalt.err (!%p316_p7)
}
  0x11   :  { %s371_s28 = smov 128   ;;  %s372_s29 = smov 8  }
  0x12   :  { %24 = dma.hbm_to_vmem [thread:$0]  %s470_s0, 256, %s19_s19, [#allocation4], %s371_s28, %s371_s28, %s372_s29  }
  0x13   :  { %s373_s7 = smov [#allocation6]   ;;  %s320_s11 = scalar_lea.hbm %s473_s3, 1024 }
  0x14   :  { %s34_s8 = sshll.u32 %s373_s7, 4  ;;  %p321_p8 = scmp.ne.s32.totalorder %s473_s3, %s320_s11  ;;  %s35_s8 = int_to_ptr.vmem [resolvable:$true] %s34_s8 }
  0x15   :  { %p324_p9 = scmp.lt.u32.totalorder %s320_s11, %s473_s3 }
  0x17   :  { %p326_p10 = pnand %p324_p9, %p321_p8 }
  0x19   :  { %329 = shalt.err (!%p326_p10)
}
  0x1a   :  { %s330_s16 = scalar_lea.vmem %s35_s8, 1024  ;;  %p335_p12 = scmp.lt.s32.totalorder %s35_s8, %s35_s8 }
  0x1b   :  { %p331_p11 = scmp.ne.s32.totalorder %s35_s8, %s330_s16  ;;  %p336_p13 = scmp.lt.s32.totalorder %s330_s16, %s330_s16 }
  0x1d   :  { %p337_p0 = por %p336_p13, %p335_p12 }
  0x1f   :  { %p338_p1 = pnand %p337_p0, %p331_p11 }
  0x21   :  { %341 = shalt.err (!%p338_p1)
}
  0x22   :  { %s374_s0 = smov 64   ;;  %s375_s17 = smov 4  }
  0x23   :  { %40 = dma.hbm_to_vmem [thread:$0]  %s473_s3, 1024, %s35_s8, [#allocation7], %s374_s0, %s374_s0, %s375_s17  }
  0x24   :  { %364 = dma.done.wait [#allocation4], 256  }
  0x25   :  { %365 = vsyncadd [#allocation4], 4294967040 }
  0x26   :  { %366 = dma.done.wait [#allocation7], 1024  }
  0x27   :  { %367 = vsyncadd [#allocation7], 4294966272  ;;  %v436_v0 = vld [vmem:[#allocation3] sm:$0xff]  ;;  %v438_v1 = vld [vmem:[#allocation3 + $0x8] sm:$0xff]  ;;  %v376_v3 = vmov 0.0   ;;  %vm377_vm0 = vmmov 0  }
  0x28   :  { %56 = vadd.xlane.f32.xlu0 %v436_v0  ;;  %v286_v2 = vld [vmem:[#allocation6] sm:$0xff]   ;;  %257 = vmatprep.subr.bf16.mxu0 %v376_v3  ;;  %v287_v12 = vld [vmem:[#allocation6 + $0x8] sm:$0xff]   ;;  %v288_v13 = vld [vmem:[#allocation6 + $0x10] sm:$0xff]  }
  0x29   :  { %258 = vmatpush3.bf16.msra.mxu0 %v286_v2  ;;  %v289_v14 = vld [vmem:[#allocation6 + $0x18] sm:$0xff]   ;;  %v290_v15 = vld [vmem:[#allocation6 + $0x20] sm:$0xff]   ;;  %273 = vmatprep.mubr.msk.bf16.mxu0 %vm377_vm0, %v376_v3  ;;  %v291_v16 = vld [vmem:[#allocation6 + $0x28] sm:$0xff]  }
  0x2a   :  { %259 = vmatprep.subr.bf16.mxu0 %v376_v3  ;;  %v292_v17 = vld [vmem:[#allocation6 + $0x30] sm:$0xff]   ;;  %v293_v18 = vld [vmem:[#allocation6 + $0x38] sm:$0xff]  }
  0x2b   :  { %v237_v27 = vld [vmem:[%s471_s1] ss:$0 sm:$0xff]  ;;  %s378_s1 = smov [#allocation8]  }
  0x2c   :  { %58 = vadd.xlane.f32.xlu0 %v438_v1  ;;  %v238_v31 = vld [vmem:[%s472_s2] ss:$0 sm:$0xff]  ;;  %s224_s25 = sshll.u32 %s378_s1, 4  ;;  %s225_s25 = int_to_ptr.vmem [resolvable:$true] %s224_s25 }
  0x2d   :  { %260 = vmatpush3.bf16.msra.mxu0 %v287_v12  ;;  %v239_v36 = vld [vmem:[%s474_s4] ss:$0 sm:$0xff]  ;;  %s342_s2 = scalar_lea.vmem %s225_s25, 256  ;;  %p347_p3 = scmp.lt.s32.totalorder %s225_s25, %s225_s25 }
  0x2e   :  { %261 = vmatprep.subr.bf16.mxu0 %v376_v3  ;;  %p343_p2 = scmp.ne.s32.totalorder %s225_s25, %s342_s2  ;;  %p348_p4 = scmp.lt.s32.totalorder %s342_s2, %s342_s2 }
  0x30   :  { %p349_p5 = por %p348_p4, %p347_p3 }
  0x31   :  { %262 = vmatpush3.bf16.msra.mxu0 %v288_v13 }
  0x32   :  { %263 = vmatprep.subr.bf16.mxu0 %v376_v3  ;;  %p350_p6 = pnand %p349_p5, %p343_p2 }
  0x35   :  { %264 = vmatpush3.bf16.msra.mxu0 %v289_v14 }
  0x36   :  { %265 = vmatprep.subr.bf16.mxu0 %v376_v3 }
  0x39   :  { %266 = vmatpush3.bf16.msra.mxu0 %v290_v15 }
  0x3a   :  { %267 = vmatprep.subr.bf16.mxu0 %v376_v3 }
  0x3d   :  { %268 = vmatpush3.bf16.msra.mxu0 %v291_v16 }
  0x3e   :  { %269 = vmatprep.subr.bf16.mxu0 %v376_v3 }
  0x41   :  { %270 = vmatpush3.bf16.msra.mxu0 %v292_v17 }
  0x42   :  { %271 = vmatprep.subr.bf16.mxu0 %v376_v3 }
  0x45   :  { %272 = vmatpush3.bf16.msra.mxu0 %v293_v18 }
  0xb5   :  { %v57_v4 = vpop.xlane.xlu0 %56 }
  0xb6   :  { %v61_v5 = vmul.f32 0.0078125, %v57_v4 }
  0xb8   :  { %v63_v6 = vsub.f32 %v436_v0, %v61_v5 }
  0xb9   :  { %v59_v7 = vpop.xlane.xlu0 %58 }
  0xba   :  { %v62_v8 = vmul.f32 0.0078125, %v59_v7  ;;  %v65_v9 = vmul.f32 %v63_v6, %v63_v6 }
  0xbc   :  { %v64_v10 = vsub.f32 %v438_v1, %v62_v8  ;;  %67 = vadd.xlane.f32.xlu1 %v65_v9 }
  0xbe   :  { %v66_v11 = vmul.f32 %v64_v10, %v64_v10 }
  0xc0   :  { %69 = vadd.xlane.f32.xlu1 %v66_v11 }
 0x149   :  { %v68_v19 = vpop.xlane.xlu1 %67 }
 0x14a   :  { %v72_v20 = vmul.f32 0.007874016, %v68_v19 }
 0x14c   :  { %v74_v21 = vadd.f32 1e-06, %v72_v20 }
 0x14d   :  { %v70_v22 = vpop.xlane.xlu1 %69 }
 0x14e   :  { %294 = vrsqrt.f32 %v74_v21  ;;  %v73_v23 = vmul.f32 0.007874016, %v70_v22 }
 0x150   :  { %v75_v24 = vadd.f32 1e-06, %v73_v23 }
 0x152   :  { %296 = vrsqrt.f32 %v75_v24 }
 0x158   :  { %v295_v25 = vpop.eup %294 }
 0x159   :  { %v78_v26 = vmul.f32 %v295_v25, %v63_v6 }
 0x15b   :  { %v87_v30 = vmul.f32 %v237_v27, %v78_v26 }
 0x15c   :  { %v297_v28 = vpop.eup %296 }
 0x15d   :  { %v79_v29 = vmul.f32 %v297_v28, %v64_v10  ;;  %v96_v33 = vadd.f32 %v238_v31, %v87_v30 }
 0x15f   :  { %v88_v32 = vmul.f32 %v237_v27, %v79_v29 }
 0x161   :  { %v97_v34 = vadd.f32 %v238_v31, %v88_v32 }
 0x163   :  { %v98_v35 = vpack.c.bf16 %v97_v34, %v96_v33 }
 0x165   :  { %274 = vmatmul.mubr.bf16.vlgmr.msra.gmra.mrb[0].mxu0 %v98_v35 }
 0x238   :  { %v206_v37 = vpop.f32.mrb[0].mxu0 }
 0x239   :  { %v207_v38 = vadd.f32 %v239_v36, %v206_v37  ;;  %v275_v39 = vpop.f32.mrb[1].mxu0 }
 0x23a   :  { %v209_v40 = vpop.f32.mrb[2].mxu0 }
 0x23b   :  { %v215_v41 = vadd.f32 %v207_v38, %v436_v0  ;;  %v210_v42 = vadd.f32 %v239_v36, %v209_v40  ;;  %v276_v43 = vpop.f32.mrb[3].mxu0 }
 0x23d   :  { %217 = vst [vmem:[#allocation8] sm:$0xff] %v215_v41  ;;  %v216_v44 = vadd.f32 %v210_v42, %v438_v1 }
 0x23f   :  { %218 = vst [vmem:[#allocation8 + $0x8] sm:$0xff] %v216_v44 }
 0x240   :  { %353 = shalt.err (!%p350_p6)
}
 0x241   :  { %s354_s27 = scalar_lea.hbm %s475_s5, 256 }
 0x242   :  { %p355_p7 = scmp.ne.s32.totalorder %s475_s5, %s354_s27  ;;  %p358_p8 = scmp.lt.u32.totalorder %s354_s27, %s475_s5 }
 0x244   :  { %p360_p9 = pnand %p358_p8, %p355_p7 }
 0x246   :  { %363 = shalt.err (!%p360_p9)
}
 0x247   :  { %230 = dma.vmem_to_hbm [thread:$0]  %s225_s25, 256, %s475_s5, [#allocation5], %s371_s28, %s371_s28, %s372_s29  }
 0x248   :  { %368 = dma.done.wait [#allocation5], 256  }
 0x249   :  { %369 = vsyncadd [#allocation5], 4294967040 }
 0x24a   :  { %234 = vsyncpa [#allocation4], 1 }
 0x24b   :  { %235 = vsyncpa [#allocation7], 1 }
 0x24c   :  { %236 = vsyncpa [#allocation5], 1 }

</bundles_post_ra>
